<compile_context>
chip_gen: v7x
topology: tpu7x:2x2x1
jax: 0.10.0
libtpu: 0.0.40
codegen_flags: <defaults>
</compile_context>

<pallas_src>
import functools

import jax
import jax.numpy as jnp
from jax.experimental import pallas as pl
from jax.experimental.pallas import tpu as pltpu

LANES = 128
BLK_ROWS = 2048                        # 2048 x 128 f32 = 1 MiB per block
BLK_ELEMS = BLK_ROWS * LANES           # 262144 elements
FAST_MAX = 64 * 1024                   # per-segment single-shot threshold


def _cdiv(a, b):
    return -(-a // b)


# ----------------------------- fast single-shot path -----------------------

def _fast_kernel(sp_ref, sn_ref, out_ref, *, m, gamma):
    sp = sp_ref[...].astype(jnp.float32)           # (1, n_p)
    sn = sn_ref[...].astype(jnp.float32)           # (1, n_n)

    # ap = clamp_min(-sp + 1 + m, 0); logit_p = -ap * (sp - (1 - m)) * gamma
    ap = jnp.maximum(1.0 + m - sp, 0.0)
    logit_p = -ap * (sp - (1.0 - m)) * gamma
    # an = clamp_min(sn + m, 0); logit_n = an * (sn - m) * gamma
    an = jnp.maximum(sn + m, 0.0)
    logit_n = an * (sn - m) * gamma

    mp = jnp.max(logit_p, keepdims=True)           # (1, 1)
    lse_p = mp + jnp.log(jnp.sum(jnp.exp(logit_p - mp), keepdims=True))
    mn = jnp.max(logit_n, keepdims=True)
    lse_n = mn + jnp.log(jnp.sum(jnp.exp(logit_n - mn), keepdims=True))

    z = lse_p + lse_n                              # (1, 1)
    loss = jnp.maximum(z, 0.0) + jnp.log1p(jnp.exp(-jnp.abs(z)))   # softplus
    out_ref[0, 0] = jnp.sum(loss)                  # scalar -> SMEM


def _circle_loss_fast(sp, sn, m, gamma):
    n_p, n_n = int(sp.shape[0]), int(sn.shape[0])
    sp2 = sp.reshape(1, n_p)                       # free reshape, no copy
    sn2 = sn.reshape(1, n_n)
    kernel = functools.partial(_fast_kernel, m=float(m), gamma=float(gamma))
    out = pl.pallas_call(
        kernel,
        grid=(1,),
        in_specs=[pl.BlockSpec((1, n_p), lambda i: (0, 0)),
                  pl.BlockSpec((1, n_n), lambda i: (0, 0))],
        out_specs=pl.BlockSpec(memory_space=pltpu.MemorySpace.SMEM),
        out_shape=jax.ShapeDtypeStruct((1, 1), jnp.float32),
    )(sp2, sn2)
    return out[0, 0]


# ----------------------------- streaming path ------------------------------

def _stream_kernel(x_ref, out_ref, m_acc, s_acc, *,
                   m, gamma, n_p, n_n, nb_p, nb_n):
    s = pl.program_id(0)          # segment: 0 = positives, 1 = negatives
    j = pl.program_id(1)          # block within segment
    last_j = pl.num_programs(1) - 1

    @pl.when(j == 0)
    def _init():
        m_acc[...] = jnp.full(m_acc.shape, -jnp.inf, dtype=jnp.float32)
        s_acc[...] = jnp.zeros(s_acc.shape, dtype=jnp.float32)

    def update(logit):
        """Lane-wise (128 independent chains) online LSE step on (BLK_ROWS, 128)."""
        m_old = m_acc[...]                                          # (1, 128)
        m_new = jnp.maximum(m_old, jnp.max(logit, axis=0, keepdims=True))
        # exp(-inf - -inf) guard for lanes that have not yet seen a valid value.
        shift = jnp.where(m_new == -jnp.inf, 0.0, m_new)
        s_acc[...] = (s_acc[...] * jnp.exp(m_old - shift)
                      + jnp.sum(jnp.exp(logit - shift), axis=0, keepdims=True))
        m_acc[...] = m_new

    def masked(logit, valid):
        row = jax.lax.broadcasted_iota(jnp.int32, logit.shape, 0)
        col = jax.lax.broadcasted_iota(jnp.int32, logit.shape, 1)
        return jnp.where(row * LANES + col < valid, logit, -jnp.inf)

    @pl.when(jnp.logical_and(s == 0, j < nb_p))
    def _pos():
        x = x_ref[...].astype(jnp.float32)
        ap = jnp.maximum(1.0 + m - x, 0.0)
        logit = -ap * (x - (1.0 - m)) * gamma

        @pl.when(j == nb_p - 1)                 # tail block: mask the padding
        def _():
            update(masked(logit, n_p - (nb_p - 1) * BLK_ELEMS))

        @pl.when(j < nb_p - 1)                  # interior block: no mask ops
        def _():
            update(logit)

    @pl.when(jnp.logical_and(s == 1, j < nb_n))
    def _neg():
        x = x_ref[...].astype(jnp.float32)
        an = jnp.maximum(x + m, 0.0)
        logit = an * (x - m) * gamma

        @pl.when(j == nb_n - 1)
        def _():
            update(masked(logit, n_n - (nb_n - 1) * BLK_ELEMS))

        @pl.when(j < nb_n - 1)
        def _():
            update(logit)

    @pl.when(j == last_j)
    def _finalize():
        # Single cross-lane collapse of the lane-wide accumulators.
        gm = jnp.max(m_acc[...], keepdims=True)                     # (1, 1)
        shift = jnp.where(gm == -jnp.inf, 0.0, gm)
        tot = jnp.sum(s_acc[...] * jnp.exp(m_acc[...] - shift), keepdims=True)
        lse = shift + jnp.log(tot)                                  # (1, 1)
        out_ref[...] = jnp.zeros(out_ref.shape, jnp.float32) + lse


def _circle_loss_stream(sp, sn, m, gamma):
    n_p, n_n = int(sp.shape[0]), int(sn.shape[0])
    nb_p = _cdiv(n_p, BLK_ELEMS)
    nb_n = _cdiv(n_n, BLK_ELEMS)
    nb = max(nb_p, nb_n)
    pad_p = nb_p * BLK_ELEMS
    pad_n = nb_n * BLK_ELEMS

    buf_dtype = jnp.promote_types(sp.dtype, sn.dtype)
    # One fused pad per segment + concat -> a single sublane-dense buffer.
    sp_pad = jnp.pad(sp.astype(buf_dtype), (0, pad_p - n_p))
    sn_pad = jnp.pad(sn.astype(buf_dtype), (0, pad_n - n_n))
    buf = jnp.concatenate([sp_pad, sn_pad]).reshape(-1, LANES)

    def in_map(s, j):
        # Clamp so no-op steps of the shorter segment revisit (and therefore
        # never re-fetch) the previous block instead of reading out of range.
        jp = jnp.minimum(j, nb_p - 1)
        jn = jnp.minimum(j, nb_n - 1)
        return (jnp.where(s == 0, jp, nb_p + jn), 0)

    kernel = functools.partial(
        _stream_kernel, m=float(m), gamma=float(gamma),
        n_p=n_p, n_n=n_n, nb_p=nb_p, nb_n=nb_n)

    lse = pl.pallas_call(
        kernel,
        grid=(2, nb),
        in_specs=[pl.BlockSpec((BLK_ROWS, LANES), in_map)],
        out_specs=pl.BlockSpec((1, 8, LANES), lambda s, j: (s, 0, 0)),
        out_shape=jax.ShapeDtypeStruct((2, 8, LANES), jnp.float32),
        scratch_shapes=[pltpu.VMEM((1, LANES), jnp.float32),
                        pltpu.VMEM((1, LANES), jnp.float32)],
        compiler_params=pltpu.CompilerParams(
            dimension_semantics=("parallel", "arbitrary")),
    )(buf)

    z = lse[0, 0, 0] + lse[1, 0, 0]
    return jax.nn.softplus(z)           # trivial epilogue in plain JAX


# ----------------------------- public API / reference ----------------------

def circle_loss_ref(sp, sn, m, gamma):
    """Pure-JAX reference mirroring the PyTorch module."""
    sp = sp.astype(jnp.float32)
    sn = sn.astype(jnp.float32)
    ap = jnp.maximum(-sp + 1.0 + m, 0.0)
    an = jnp.maximum(sn + m, 0.0)
    logit_p = -ap * (sp - (1.0 - m)) * gamma
    logit_n = an * (sn - m) * gamma
    z = jax.nn.logsumexp(logit_n, axis=0) + jax.nn.logsumexp(logit_p, axis=0)
    return jax.nn.softplus(z)


def circle_loss(sp, sn, m, gamma):
    """Pallas TPU implementation of CircleLoss.forward(sp, sn) -> scalar."""
    n_p, n_n = int(sp.shape[0]), int(sn.shape[0])
    if n_p == 0 or n_n == 0:
        # logsumexp over an empty segment is -inf (matches torch.logsumexp);
        # degenerate case handled outside the kernel.
        return circle_loss_ref(sp, sn, m, gamma)
    if n_p <= FAST_MAX and n_n <= FAST_MAX:
        return _circle_loss_fast(sp, sn, m, gamma)
    return _circle_loss_stream(sp, sn, m, gamma)


if __name__ == "__main__":
    key = jax.random.PRNGKey(0)
    kp1, kn1, kp2, kn2, kp3, kn3 = jax.random.split(key, 6)
    # CircleLoss hyperparameters (module __init__ args).
    m, gamma = 0.25, 64.0

    # Small shapes (fast single-shot path), typical similarity scores in (-1, 1).
    sp = jax.random.uniform(kp1, (8,), jnp.float32, minval=-1.0, maxval=1.0)
    sn = jax.random.uniform(kn1, (32,), jnp.float32, minval=-1.0, maxval=1.0)
    loss = jax.block_until_ready(circle_loss(sp, sn, m, gamma))
    ref = circle_loss_ref(sp, sn, m, gamma)
    assert jnp.isfinite(loss), loss
    assert jnp.allclose(loss, ref, rtol=1e-5, atol=1e-5), (loss, ref)

    # Moderate shapes: still single-shot, exercises multi-vreg reductions and
    # non-128-multiple sizes.
    sp2 = jax.random.uniform(kp2, (5000,), jnp.float32, minval=-1.0, maxval=1.0)
    sn2 = jax.random.uniform(kn2, (7000,), jnp.float32, minval=-1.0, maxval=1.0)
    loss2 = jax.block_until_ready(circle_loss(sp2, sn2, m, gamma))
    ref2 = circle_loss_ref(sp2, sn2, m, gamma)
    assert jnp.allclose(loss2, ref2, rtol=1e-4, atol=1e-4), (loss2, ref2)

    # Large shapes (streaming path): multi-block positives (interior unmasked
    # block + masked tail block), single masked block of negatives, no-op
    # steps with clamped index map, lane-wide online-LSE carry and finalize.
    sp3 = jax.random.uniform(kp3, (300_000,), jnp.float32, minval=-1.0, maxval=1.0)
    sn3 = jax.random.uniform(kn3, (70_000,), jnp.float32, minval=-1.0, maxval=1.0)
    loss3 = jax.block_until_ready(circle_loss(sp3, sn3, m, gamma))
    ref3 = circle_loss_ref(sp3, sn3, m, gamma)
    assert jnp.allclose(loss3, ref3, rtol=1e-4, atol=1e-4), (loss3, ref3)

    print("KERNEL_OK")
</pallas_src>

<mosaic_0001>
module attributes {stable_mosaic.version = 11 : i64} {
  func.func @_fast_kernel(%arg0: i32, %arg1: memref<1x8xf32, #tpu.memory_space<vmem>>, %arg2: memref<1x32xf32, #tpu.memory_space<vmem>>, %arg3: memref<1x1xf32, #tpu.memory_space<smem>>) attributes {dimension_semantics = [#tpu.dimension_semantics<arbitrary>], iteration_bounds = array<i64: 1>, scalar_prefetch = 0 : i64, scratch_operands = 0 : i64, tpu.core_type = #tpu.core_type<tc>, window_params = [{pipeline_mode = #tpu.pipeline_mode<synchronous>, transform_indices = @transform_0, window_bounds = array<i64: 1, 8>}, {pipeline_mode = #tpu.pipeline_mode<synchronous>, transform_indices = @transform_1, window_bounds = array<i64: 1, 32>}, {transform_indices = @transform_2, window_bounds = array<i64: 1, 1>}]} {
    %c0 = arith.constant 0 : index
    %c0_0 = arith.constant 0 : index
    %0 = vector.load %arg1[%c0, %c0_0] : memref<1x8xf32, #tpu.memory_space<vmem>>, vector<1x8xf32>
    %c0_1 = arith.constant 0 : index
    %c0_2 = arith.constant 0 : index
    %1 = vector.load %arg2[%c0_1, %c0_2] : memref<1x32xf32, #tpu.memory_space<vmem>>, vector<1x32xf32>
    %cst = arith.constant 1.250000e+00 : f32
    %2 = vector.broadcast %cst : f32 to vector<1x8xf32>
    %3 = arith.subf %2, %0 : vector<1x8xf32>
    %cst_3 = arith.constant 0.000000e+00 : f32
    %4 = vector.broadcast %cst_3 : f32 to vector<1x8xf32>
    %5 = arith.maximumf %3, %4 : vector<1x8xf32>
    %cst_4 = arith.constant 0.000000e+00 : f32
    %6 = vector.broadcast %cst_4 : f32 to vector<1x8xf32>
    %7 = arith.subf %6, %5 : vector<1x8xf32>
    %cst_5 = arith.constant 7.500000e-01 : f32
    %8 = vector.broadcast %cst_5 : f32 to vector<1x8xf32>
    %9 = arith.subf %0, %8 : vector<1x8xf32>
    %10 = arith.mulf %7, %9 : vector<1x8xf32>
    %cst_6 = arith.constant 6.400000e+01 : f32
    %11 = vector.broadcast %cst_6 : f32 to vector<1x8xf32>
    %12 = arith.mulf %10, %11 : vector<1x8xf32>
    %cst_7 = arith.constant 2.500000e-01 : f32
    %13 = vector.broadcast %cst_7 : f32 to vector<1x32xf32>
    %14 = arith.addf %1, %13 : vector<1x32xf32>
    %cst_8 = arith.constant 0.000000e+00 : f32
    %15 = vector.broadcast %cst_8 : f32 to vector<1x32xf32>
    %16 = arith.maximumf %14, %15 : vector<1x32xf32>
    %cst_9 = arith.constant 2.500000e-01 : f32
    %17 = vector.broadcast %cst_9 : f32 to vector<1x32xf32>
    %18 = arith.subf %1, %17 : vector<1x32xf32>
    %19 = arith.mulf %16, %18 : vector<1x32xf32>
    %cst_10 = arith.constant 6.400000e+01 : f32
    %20 = vector.broadcast %cst_10 : f32 to vector<1x32xf32>
    %21 = arith.mulf %19, %20 : vector<1x32xf32>
    %22 = vector.shape_cast %12 : vector<1x8xf32> to vector<1x1x8xf32>
    %cst_11 = arith.constant dense<0xFF800000> : vector<1xf32>
    %23 = vector.multi_reduction <maximumf>, %22, %cst_11 [1, 2] : vector<1x1x8xf32> to vector<1xf32>
    %24 = vector.shape_cast %23 : vector<1xf32> to vector<1x1x1xf32>
    %25 = vector.extract %24[0, 0, 0] : f32 from vector<1x1x1xf32>
    %26 = vector.broadcast %25 : f32 to vector<1x1xf32>
    %27 = vector.broadcast %26 : vector<1x1xf32> to vector<1x8xf32>
    %28 = arith.subf %12, %27 : vector<1x8xf32>
    %29 = math.exp %28 : vector<1x8xf32>
    %30 = vector.shape_cast %29 : vector<1x8xf32> to vector<1x1x8xf32>
    %cst_12 = arith.constant dense<0.000000e+00> : vector<1xf32>
    %31 = vector.multi_reduction <add>, %30, %cst_12 [1, 2] : vector<1x1x8xf32> to vector<1xf32>
    %32 = vector.shape_cast %31 : vector<1xf32> to vector<1x1x1xf32>
    %33 = vector.extract %32[0, 0, 0] : f32 from vector<1x1x1xf32>
    %34 = vector.broadcast %33 : f32 to vector<1x1xf32>
    %35 = math.log %34 : vector<1x1xf32>
    %36 = arith.addf %26, %35 : vector<1x1xf32>
    %37 = vector.shape_cast %21 : vector<1x32xf32> to vector<1x1x32xf32>
    %cst_13 = arith.constant dense<0xFF800000> : vector<1xf32>
    %38 = vector.multi_reduction <maximumf>, %37, %cst_13 [1, 2] : vector<1x1x32xf32> to vector<1xf32>
    %39 = vector.shape_cast %38 : vector<1xf32> to vector<1x1x1xf32>
    %40 = vector.extract %39[0, 0, 0] : f32 from vector<1x1x1xf32>
    %41 = vector.broadcast %40 : f32 to vector<1x1xf32>
    %42 = vector.broadcast %41 : vector<1x1xf32> to vector<1x32xf32>
    %43 = arith.subf %21, %42 : vector<1x32xf32>
    %44 = math.exp %43 : vector<1x32xf32>
    %45 = vector.shape_cast %44 : vector<1x32xf32> to vector<1x1x32xf32>
    %cst_14 = arith.constant dense<0.000000e+00> : vector<1xf32>
    %46 = vector.multi_reduction <add>, %45, %cst_14 [1, 2] : vector<1x1x32xf32> to vector<1xf32>
    %47 = vector.shape_cast %46 : vector<1xf32> to vector<1x1x1xf32>
    %48 = vector.extract %47[0, 0, 0] : f32 from vector<1x1x1xf32>
    %49 = vector.broadcast %48 : f32 to vector<1x1xf32>
    %50 = math.log %49 : vector<1x1xf32>
    %51 = arith.addf %41, %50 : vector<1x1xf32>
    %52 = arith.addf %36, %51 : vector<1x1xf32>
    %cst_15 = arith.constant 0.000000e+00 : f32
    %53 = vector.broadcast %cst_15 : f32 to vector<1x1xf32>
    %54 = arith.maximumf %52, %53 : vector<1x1xf32>
    %55 = math.absf %52 : vector<1x1xf32>
    %cst_16 = arith.constant 0.000000e+00 : f32
    %56 = vector.broadcast %cst_16 : f32 to vector<1x1xf32>
    %57 = arith.subf %56, %55 : vector<1x1xf32>
    %58 = math.exp %57 : vector<1x1xf32>
    %59 = math.log1p %58 : vector<1x1xf32>
    %60 = arith.addf %54, %59 : vector<1x1xf32>
    %61 = vector.shape_cast %60 : vector<1x1xf32> to vector<1x1x1xf32>
    %cst_17 = arith.constant dense<0.000000e+00> : vector<1xf32>
    %62 = vector.multi_reduction <add>, %61, %cst_17 [1, 2] : vector<1x1x1xf32> to vector<1xf32>
    %63 = vector.shape_cast %62 : vector<1xf32> to vector<1x1x1xf32>
    %64 = vector.extract %63[0, 0, 0] : f32 from vector<1x1x1xf32>
    %c0_18 = arith.constant 0 : index
    %c0_19 = arith.constant 0 : index
    %65 = memref.load %arg3[%c0_18, %c0_19] : memref<1x1xf32, #tpu.memory_space<smem>>
    memref.store %64, %arg3[%c0_18, %c0_19] : memref<1x1xf32, #tpu.memory_space<smem>>
    return
  }
  func.func @transform_0(%arg0: i32) -> (i32, i32) {
    %c0_i32 = arith.constant 0 : i32
    %c0_i32_0 = arith.constant 0 : i32
    %c0_i32_1 = arith.constant 0 : i32
    return %c0_i32, %c0_i32_0 : i32, i32
  }
  func.func @transform_1(%arg0: i32) -> (i32, i32) {
    %c0_i32 = arith.constant 0 : i32
    %c0_i32_0 = arith.constant 0 : i32
    %c0_i32_1 = arith.constant 0 : i32
    return %c0_i32, %c0_i32_0 : i32, i32
  }
  func.func @transform_2(%arg0: i32) -> (i32, i32) {
    %c0_i32 = arith.constant 0 : i32
    %c0_i32_0 = arith.constant 0 : i32
    %c0_i32_1 = arith.constant 0 : i32
    return %c0_i32, %c0_i32_0 : i32, i32
  }
}

</mosaic_0001>

<bundles_post_ra>
// kernel: tpu_custom_call.1
= control target key start
LH: loop header
LB: loop body
LE: loop exit
PB: predicated region body
PF: predicated region fallthrough
CT: control target
= control target key end

     0   :  { %7 = vsyncpa [#allocation3], 0  ;;  %s242_s0 = inlined_call_operand.hbm [shape: f32[1,8], index: 0, kind: input, shape index: {}]   ;;  %s243_s1 = inlined_call_operand.vmem [shape: f32[1,32], index: 1, kind: input, shape index: {}]   ;;  %s244_s2 = inlined_call_operand.hbm [shape: f32[1,1], index: 2, kind: output, shape index: {}]  }
   0x1   :  { %8 = vsyncpa [#allocation4], 0  ;;  %s191_s9 = smov [#allocation2]   ;;  %s155_s13 = scalar_lea.hbm %s242_s0, 16 }
   0x2   :  { %s15_s10 = sshll.u32 %s191_s9, 4  ;;  %p156_p0 = scmp.ne.s32.totalorder %s242_s0, %s155_s13  ;;  %s16_s10 = int_to_ptr.vmem [resolvable:$true] %s15_s10 }
   0x3   :  { %p159_p1 = scmp.lt.u32.totalorder %s155_s13, %s242_s0 }
   0x5   :  { %p161_p2 = pnand %p159_p1, %p156_p0 }
   0x7   :  { %164 = shalt.err (!%p161_p2)
}
   0x8   :  { %s165_s18 = scalar_lea.vmem %s16_s10, 16  ;;  %s169_s19 = scalar_lea.vmem %s16_s10, 32 }
   0x9   :  { %p166_p3 = scmp.ne.s32.totalorder %s16_s10, %s165_s18  ;;  %p170_p4 = scmp.lt.s32.totalorder %s16_s10, %s16_s10 }
   0xa   :  { %p171_p5 = scmp.lt.s32.totalorder %s169_s19, %s165_s18 }
   0xc   :  { %p172_p6 = por %p171_p5, %p170_p4 }
   0xe   :  { %p173_p7 = pnand %p172_p6, %p166_p3 }
  0x10   :  { %176 = shalt.err (!%p173_p7)
}
  0x11   :  { %18 = dma.hbm_to_vmem [thread:$0]  %s242_s0, 16, %s16_s10, [#allocation3]  }
  0x12   :  { %187 = dma.done.wait [#allocation3], 16  }
  0x13   :  { %188 = vsyncadd [#allocation3], 4294967280  ;;  %v24_v0 = vld [vmem:[#allocation2] sm:$0x1]  ;;  %vm37_vm0 = vcmask 57344   ;;  %vm66_vm1 = vcmask 253952  }
  0x14   :  { %v26_v1 = vsub.f32 1.25, %v24_v0  ;;  %v129_v3 = vadd.f32 -0.75, %v24_v0  ;;  %v25_v8 = vld [vmem:[%s243_s1] sm:$0x1]  ;;  %s177_s29 = scalar_lea.hbm %s244_s2, 16 }
  0x15   :  { %v32_v9 = vadd.f32 0.25, %v25_v8  ;;  %v130_v11 = vadd.f32 -0.25, %v25_v8  ;;  %p178_p8 = scmp.ne.s32.totalorder %s244_s2, %s177_s29  ;;  %p181_p9 = scmp.lt.u32.totalorder %s177_s29, %s244_s2 }
  0x16   :  { %v27_v2 = vmax.f32 %v26_v1, 0.0 }
  0x17   :  { %v33_v10 = vmax.f32 %v32_v9, 0.0  ;;  %p183_p10 = pnand %p181_p9, %p178_p8 }
  0x18   :  { %v28_v4 = vsub.f32 0.0, %v27_v2 }
  0x19   :  { %v35_v12 = vmul.f32 %v130_v11, %v33_v10 }
  0x1a   :  { %v30_v5 = vmul.f32 %v129_v3, %v28_v4 }
  0x1b   :  { %v36_v13 = vmul.f32 64.0, %v35_v12 }
  0x1c   :  { %v31_v6 = vmul.f32 64.0, %v30_v5 }
  0x1d   :  { %v67_v14 = vsel %vm66_vm1, %v36_v13, -inf }
  0x1e   :  { %v38_v7 = vsel %vm37_vm0, %v31_v6, -inf  ;;  %68 = vmax.xlane.f32.xlu1 %v67_v14 }
  0x1f   :  { %39 = vmax.xlane.f32.xlu0 %v38_v7 }
  0xab   :  { %v69_v27 = vpop.xlane.xlu1 %68 }
  0xac   :  { %v40_v15 = vpop.xlane.xlu0 %39  ;;  %v70_v28 = vrot.slane %v69_v27, 4 }
  0xad   :  { %v41_v16 = vrot.slane %v40_v15, 4 }
  0xae   :  { %v71_v29 = vmax.f32 %v69_v27, %v70_v28 }
  0xaf   :  { %v42_v17 = vmax.f32 %v40_v15, %v41_v16 }
  0xb0   :  { %v72_v30 = vrot.slane %v71_v29, 2 }
  0xb1   :  { %v43_v18 = vrot.slane %v42_v17, 2 }
  0xb2   :  { %v73_v34 = vmax.f32 %v71_v29, %v72_v30 }
  0xb3   :  { %v44_v19 = vmax.f32 %v42_v17, %v43_v18 }
  0xb4   :  { %v74_v37 = vrot.slane %v73_v34, 1 }
  0xb5   :  { %v45_v20 = vrot.slane %v44_v19, 1 }
  0xb6   :  { %v75_v40 = vmax.f32 %v73_v34, %v74_v37 }
  0xb7   :  { %v46_v21 = vmax.f32 %v44_v19, %v45_v20 }
  0xb9   :  { %131 = vpush %v46_v21 }
  0xea   :  { %s225_s0 = spop %131 }
  0xeb   :  { %v48_v22 = vstv %s225_s0 }
  0xec   :  { %v49_v23 = vsub.f32 %v31_v6, %v48_v22 }
  0xee   :  { %v50_v24 = vmul.f32 1.442695, %v49_v23 }
  0xf0   :  { %143 = vpow2.f32 %v50_v24 }
  0xfa   :  { %v144_v25 = vpop.eup %143 }
  0xfb   :  { %v52_v26 = vsel %vm37_vm0, %v144_v25, 0.0 }
  0xfc   :  { %53 = vadd.xlane.f32.xlu0 %v52_v26 }
 0x189   :  { %v54_v31 = vpop.xlane.xlu0 %53 }
 0x18a   :  { %v55_v32 = vrot.slane %v54_v31, 4 }
 0x18c   :  { %v56_v33 = vadd.f32 %v55_v32, %v54_v31 }
 0x18e   :  { %v57_v35 = vrot.slane %v56_v33, 2 }
 0x190   :  { %v58_v36 = vadd.f32 %v57_v35, %v56_v33 }
 0x192   :  { %v59_v38 = vrot.slane %v58_v36, 1 }
 0x194   :  { %v60_v39 = vadd.f32 %v59_v38, %v58_v36 }
 0x196   :  { %133 = vpush %v60_v39 }
 0x197   :  { %135 = vpush %v75_v40 }
 0x1c7   :  { %s134_s1 = spop %133 }
 0x1c8   :  { %s136_s24 = spop %135  ;;  %v62_v53 = vstv %s134_s1 }
 0x1c9   :  { %v77_v41 = vstv %s136_s24 }
 0x1ca   :  { %v78_v42 = vsub.f32 %v36_v13, %v77_v41 }
 0x1cc   :  { %v79_v43 = vmul.f32 1.442695, %v78_v42 }
 0x1ce   :  { %145 = vpow2.f32 %v79_v43 }
 0x1cf   :  { %147 = vlog2.f32 %v62_v53 }
 0x1d8   :  { %v146_v44 = vpop.eup %145 }
 0x1d9   :  { %v81_v45 = vsel %vm66_vm1, %v146_v44, 0.0  ;;  %v148_v55 = vpop.eup %147 }
 0x1da   :  { %82 = vadd.xlane.f32.xlu1 %v81_v45  ;;  %v64_v56 = vmul.f32 0.6931472, %v148_v55 }
 0x1dc   :  { %v65_v59 = vadd.f32 %v64_v56, %v48_v22 }
 0x267   :  { %v83_v46 = vpop.xlane.xlu1 %82 }
 0x268   :  { %v84_v47 = vrot.slane %v83_v46, 4 }
 0x26a   :  { %v85_v48 = vadd.f32 %v84_v47, %v83_v46 }
 0x26c   :  { %v86_v49 = vrot.slane %v85_v48, 2 }
 0x26e   :  { %v87_v50 = vadd.f32 %v86_v49, %v85_v48 }
 0x270   :  { %v88_v51 = vrot.slane %v87_v50, 1 }
 0x272   :  { %v89_v52 = vadd.f32 %v88_v51, %v87_v50 }
 0x274   :  { %137 = vpush %v89_v52 }
 0x2a5   :  { %s138_s25 = spop %137 }
 0x2a6   :  { %v91_v54 = vstv %s138_s25 }
 0x2a7   :  { %149 = vlog2.f32 %v91_v54 }
 0x2b1   :  { %v150_v57 = vpop.eup %149 }
 0x2b2   :  { %v93_v58 = vmul.f32 0.6931472, %v150_v57 }
 0x2b4   :  { %v94_v60 = vadd.f32 %v93_v58, %v77_v41 }
 0x2b6   :  { %v95_v61 = vadd.f32 %v94_v60, %v65_v59 }
 0x2b8   :  { %v97_v62 = vand.u32 2147483647, %v95_v61  ;;  %v96_v9 = vmax.f32 %v95_v61, 0.0 }
 0x2ba   :  { %v98_v63 = vsub.f32 0.0, %v97_v62 }
 0x2bc   :  { %v99_v0 = vmul.f32 1.442695, %v98_v63 }
 0x2be   :  { %151 = vpow2.f32 %v99_v0 }
 0x2c8   :  { %v152_v1 = vpop.eup %151 }
 0x2c9   :  { %v101_v2 = vadd.f32 1.0, %v152_v1  ;;  %v104_v3 = vmul.f32 -0.5, %v152_v1  ;;  %v107_v5 = vand.u32 2147483647, %v152_v1 }
 0x2cb   :  { %153 = vlog2.f32 %v101_v2  ;;  %v105_v4 = vadd.f32 1.0, %v104_v3  ;;  %vm108_vm2 = vcmp.lt.f32.partialorder %v107_v5, 0.0004427343 }
 0x2cd   :  { %v106_v8 = vmul.f32 %v152_v1, %v105_v4 }
 0x2d5   :  { %v154_v6 = vpop.eup %153 }
 0x2d6   :  { %v103_v7 = vmul.f32 0.6931472, %v154_v6 }
 0x2d8   :  { %v109_v10 = vsel %vm108_vm2, %v106_v8, %v103_v7 }
 0x2d9   :  { %v110_v11 = vadd.f32 %v109_v10, %v96_v9 }
 0x2db   :  { %139 = vpush %v110_v11 }
 0x30c   :  { %s140_s26 = spop %139 }
 0x30d   :  { %114 = sst [smem:[#allocation5]] %s140_s26 }
 0x30e   :  { %186 = shalt.err (!%p183_p10)
}
 0x30f   :  { %s192_s6 = smov [#allocation5]  }
 0x310   :  { %122 = dma.smem_to_hbm %s192_s6, 16, %s244_s2, [#allocation4]  }
 0x311   :  { %189 = dma.done.wait [#allocation4], 16  }
 0x312   :  { %190 = vsyncadd [#allocation4], 4294967280 }
 0x313   :  { %126 = sfence }
 0x314   :  { %127 = vsyncpa [#allocation3], 1 }
 0x315   :  { %128 = vsyncpa [#allocation4], 1 }

</bundles_post_ra>
